<compile_context>
chip_gen: v5e
topology: v5e:2x2
jax: 0.10.0
libtpu: 0.0.40
codegen_flags: <defaults>
</compile_context>

<pallas_src>
import functools
import math

import jax
import jax.numpy as jnp
from jax.experimental import pallas as pl
from jax.experimental.pallas import tpu as pltpu


# ---------------------------------------------------------------------------
# helpers
# ---------------------------------------------------------------------------
def _round_up(x, m):
    return ((x + m - 1) // m) * m


def _pad2d(x, rows, cols):
    r, c = x.shape[-2], x.shape[-1]
    if r == rows and c == cols:
        return x
    pad = [(0, 0)] * (x.ndim - 2) + [(0, rows - r), (0, cols - c)]
    return jnp.pad(x, pad)


# ---------------------------------------------------------------------------
# LoRaLinear:  out = x @ W + b   (W stored as (in_features, out_features))
# Tiled (M, N, K) GEMM with f32 accumulator; K is the reduction ("arbitrary") axis.
# ---------------------------------------------------------------------------
def _linear_kernel(x_ref, w_ref, b_ref, o_ref, acc_ref):
    k = pl.program_id(2)

    @pl.when(k == 0)
    def _():
        acc_ref[...] = jnp.zeros_like(acc_ref)

    acc_ref[...] += jnp.dot(x_ref[...], w_ref[...],
                            preferred_element_type=jnp.float32)

    @pl.when(k == pl.num_programs(2) - 1)
    def _():
        o_ref[...] = (acc_ref[...] + b_ref[...].astype(jnp.float32)
                      ).astype(o_ref.dtype)


def lora_linear(x, weight, bias=None, *, tm_max=256, tn_max=256, tk_max=512):
    """input @ weight + bias, matching LoRaLinear.forward."""
    K, N = weight.shape
    orig_shape = x.shape
    x2d = x.reshape(-1, K)
    M = x2d.shape[0]

    # Adaptive, lane/sublane-aligned tiles (collapse to one block for tiny shapes).
    tk = min(tk_max, _round_up(K, 128))
    tn = min(tn_max, _round_up(N, 128))
    tm = min(tm_max, _round_up(M, 16))     # mult of 16 -> valid for bf16 too
    Kp = _round_up(K, tk)
    Np = _round_up(N, tn)
    Mp = _round_up(M, tm)

    xp = _pad2d(x2d, Mp, Kp)
    wp = _pad2d(weight, Kp, Np)
    if bias is None:
        bias = jnp.zeros((N,), dtype=x.dtype)
    bp = _pad2d(bias.reshape(1, N), 1, Np)

    grid = (Mp // tm, Np // tn, Kp // tk)
    itemsize = jnp.dtype(x2d.dtype).itemsize

    out = pl.pallas_call(
        _linear_kernel,
        out_shape=jax.ShapeDtypeStruct((Mp, Np), x.dtype),
        grid_spec=pltpu.PrefetchScalarGridSpec(
            num_scalar_prefetch=0,
            grid=grid,
            in_specs=[
                pl.BlockSpec((tm, tk), lambda i, j, k: (i, k)),   # x tile
                pl.BlockSpec((tk, tn), lambda i, j, k: (k, j)),   # weight tile
                pl.BlockSpec((1, tn), lambda i, j, k: (0, j)),    # bias row
            ],
            out_specs=pl.BlockSpec((tm, tn), lambda i, j, k: (i, j)),
            scratch_shapes=[pltpu.VMEM((tm, tn), jnp.float32)],
        ),
        compiler_params=pltpu.CompilerParams(
            dimension_semantics=("parallel", "parallel", "arbitrary")),
        cost_estimate=pl.CostEstimate(
            flops=2 * Mp * Kp * Np,
            transcendentals=0,
            bytes_accessed=(Mp * Kp + Kp * Np + Mp * Np) * itemsize),
    )(xp, wp, bp)

    return out[:M, :N].reshape(*orig_shape[:-1], N)


# ---------------------------------------------------------------------------
# SelfAttentionFunction: softmax((q @ k^T + mask) / sqrt(head_dim)) @ v
# One fused kernel per (batch * head); scores never leave VMEM.
# ---------------------------------------------------------------------------
def _attention_kernel(q_ref, k_ref, v_ref, m_ref, o_ref, *, scale):
    q = q_ref[0].astype(jnp.float32)                       # (Sq_p, Dh_p)
    k = k_ref[0].astype(jnp.float32)                       # (Sk_p, Dh_p)
    v = v_ref[0].astype(jnp.float32)                       # (Sk_p, Dh_p)

    s = jnp.einsum("qd,kd->qk", q, k,
                   preferred_element_type=jnp.float32)     # (Sq_p, Sk_p)
    s = (s + m_ref[0]) * scale                             # mask added BEFORE scale
    s = s - jnp.max(s, axis=-1, keepdims=True)
    p = jnp.exp(s)
    a = p / jnp.sum(p, axis=-1, keepdims=True)

    o = jnp.dot(a, v, preferred_element_type=jnp.float32)  # (Sq_p, Dh_p)
    o_ref[0] = o.astype(o_ref.dtype)


def self_attention(q, k, v, attention_mask=None, *, mask_value=-1e30):
    """q, k, v: (B, H, S, Dh). Returns attention output (B, H, S, Dh)."""
    B, H, Sq, Dh = q.shape
    Sk = k.shape[2]
    scale = 1.0 / math.sqrt(Dh)          # key.size(-1) ** 0.5 in the reference

    Sq_p = _round_up(Sq, 16)             # sublane-friendly (bf16-safe)
    Sk_p = _round_up(Sk, 128)            # lane axis of the score matrix
    Dh_p = _round_up(Dh, 128)            # lane axis of q/k/v/out
    BH = B * H

    def prep(t, s, s_p):
        t = t.reshape(BH, s, Dh)
        return jnp.pad(t, ((0, 0), (0, s_p - s), (0, Dh_p - Dh)))

    qp = prep(q, Sq, Sq_p)
    kp = prep(k, Sk, Sk_p)
    vp = prep(v, Sk, Sk_p)

    # Additive mask: user mask (applied before scaling, as in torch) plus a
    # large negative on padded key columns so they vanish in the softmax.
    pad_cols = jnp.where(jnp.arange(Sk_p) >= Sk, mask_value, 0.0
                         ).astype(jnp.float32)
    base = jnp.zeros((Sq_p, Sk_p), jnp.float32) + pad_cols[None, :]
    if attention_mask is None:
        mask_arr = base[None]                                   # (1, Sq_p, Sk_p)
        mask_map = lambda i: (0, 0, 0)
    else:
        am = jnp.broadcast_to(attention_mask, (B, H, Sq, Sk)).astype(jnp.float32)
        am = am.reshape(BH, Sq, Sk)
        am = jnp.pad(am, ((0, 0), (0, Sq_p - Sq), (0, Sk_p - Sk)))
        mask_arr = am + base[None]                              # (BH, Sq_p, Sk_p)
        mask_map = lambda i: (i, 0, 0)

    kernel = functools.partial(_attention_kernel, scale=scale)
    out = pl.pallas_call(
        kernel,
        out_shape=jax.ShapeDtypeStruct((BH, Sq_p, Dh_p), q.dtype),
        grid_spec=pltpu.PrefetchScalarGridSpec(
            num_scalar_prefetch=0,
            grid=(BH,),
            in_specs=[
                pl.BlockSpec((1, Sq_p, Dh_p), lambda i: (i, 0, 0)),  # q
                pl.BlockSpec((1, Sk_p, Dh_p), lambda i: (i, 0, 0)),  # k
                pl.BlockSpec((1, Sk_p, Dh_p), lambda i: (i, 0, 0)),  # v
                pl.BlockSpec((1, Sq_p, Sk_p), mask_map),             # additive mask
            ],
            out_specs=pl.BlockSpec((1, Sq_p, Dh_p), lambda i: (i, 0, 0)),
        ),
        compiler_params=pltpu.CompilerParams(
            dimension_semantics=("parallel",)),
    )(qp, kp, vp, mask_arr)

    return out[:, :Sq, :Dh].reshape(B, H, Sq, Dh)


# ---------------------------------------------------------------------------
# LoRaMHA.forward (default construction: LoRaLinear c_attn / c_proj, no cache)
# ---------------------------------------------------------------------------
def lora_mha_forward(hidden_states, w_attn, b_attn, w_proj, b_proj,
                     num_heads, attention_mask=None):
    B, S, E = hidden_states.shape
    head_dim = E // num_heads

    qkv = lora_linear(hidden_states, w_attn, b_attn)          # c_attn
    q, k, v = jnp.split(qkv, 3, axis=-1)

    def split_heads(t):
        return t.reshape(B, S, num_heads, head_dim).transpose(0, 2, 1, 3)

    q, k, v = split_heads(q), split_heads(k), split_heads(v)

    attn_out = self_attention(q, k, v, attention_mask)        # (B, H, S, Dh)
    attn_out = attn_out.transpose(0, 2, 1, 3).reshape(B, S, E)

    out = lora_linear(attn_out, w_proj, b_proj)               # c_proj
    # attn_dropout / resid_dropout: identity in eval mode.
    return out


# ---------------------------------------------------------------------------
# demo / correctness check
# ---------------------------------------------------------------------------
if __name__ == "__main__":
    # Small GPT2-style shapes: batch=2, seq=8, embed_dim=32, 4 heads (head_dim=8).
    B, S, E, H = 2, 8, 32, 4
    Dh = E // H

    key = jax.random.PRNGKey(0)
    kx, kw1, kb1, kw2, kb2 = jax.random.split(key, 5)

    x = jax.random.normal(kx, (B, S, E), dtype=jnp.float32)
    bound = 1.0 / math.sqrt(E)
    w_attn = jax.random.uniform(kw1, (E, 3 * E), minval=-bound, maxval=bound,
                                dtype=jnp.float32)   # stored transposed: (in, out)
    b_attn = jax.random.uniform(kb1, (3 * E,), minval=-bound, maxval=bound,
                                dtype=jnp.float32)
    w_proj = jax.random.uniform(kw2, (E, E), minval=-bound, maxval=bound,
                                dtype=jnp.float32)
    b_proj = jax.random.uniform(kb2, (E,), minval=-bound, maxval=bound,
                                dtype=jnp.float32)

    # Additive attention mask (e.g. causal), broadcastable to (B, H, S, S).
    causal = jnp.tril(jnp.ones((S, S), dtype=bool))
    attn_mask = jnp.where(causal, 0.0, -1e9).astype(jnp.float32)[None, None]

    out = lora_mha_forward(x, w_attn, b_attn, w_proj, b_proj, H, attn_mask)
    out = jax.block_until_ready(out)

    # ---- pure-JAX reference replicating the torch forward ----
    qkv = x @ w_attn + b_attn
    q, k, v = jnp.split(qkv, 3, axis=-1)

    def sh(t):
        return t.reshape(B, S, H, Dh).transpose(0, 2, 1, 3)

    q, k, v = sh(q), sh(k), sh(v)
    qk = jnp.einsum("bhqd,bhkd->bhqk", q, k)
    qk = qk + attn_mask                      # mask added before scaling
    qk = qk / (Dh ** 0.5)
    a = jax.nn.softmax(qk, axis=-1)
    o = jnp.einsum("bhqk,bhkd->bhqd", a, v)
    o = o.transpose(0, 2, 1, 3).reshape(B, S, E)
    ref = o @ w_proj + b_proj

    assert out.shape == (B, S, E)
    assert jnp.allclose(out, ref, atol=1e-4, rtol=1e-4), "mismatch vs reference"

    print("KERNEL_OK")
</pallas_src>

<mosaic_0001>
module attributes {stable_mosaic.version = 11 : i64} {
  func.func @_linear_kernel(%arg0: i32, %arg1: i32, %arg2: i32, %arg3: memref<16x128xf32, #tpu.memory_space<vmem>>, %arg4: memref<128x128xf32, #tpu.memory_space<vmem>>, %arg5: memref<1x128xf32, #tpu.memory_space<vmem>>, %arg6: memref<16x128xf32, #tpu.memory_space<vmem>>, %arg7: memref<16x128xf32, #tpu.memory_space<vmem>>) attributes {dimension_semantics = [#tpu.dimension_semantics<parallel>, #tpu.dimension_semantics<parallel>, #tpu.dimension_semantics<arbitrary>], iteration_bounds = array<i64: 1, 1, 1>, scalar_prefetch = 0 : i64, scratch_operands = 1 : i64, tpu.core_type = #tpu.core_type<tc>, window_params = [{transform_indices = @transform_0, window_bounds = array<i64: 16, 128>}, {transform_indices = @transform_1, window_bounds = array<i64: 128, 128>}, {transform_indices = @transform_2, window_bounds = array<i64: 1, 128>}, {transform_indices = @transform_3, window_bounds = array<i64: 16, 128>}]} {
    %c0_i32 = arith.constant 0 : i32
    %0 = arith.cmpi eq, %arg2, %c0_i32 : i32
    %1 = arith.extui %0 : i1 to i32
    %c0_i32_0 = arith.constant 0 : i32
    %2 = arith.cmpi ne, %1, %c0_i32_0 : i32
    scf.if %2 {
      %cst_10 = arith.constant 0.000000e+00 : f32
      %12 = vector.broadcast %cst_10 : f32 to vector<16x128xf32>
      %c0_11 = arith.constant 0 : index
      %c0_12 = arith.constant 0 : index
      %13 = vector.load %arg7[%c0_11, %c0_12] : memref<16x128xf32, #tpu.memory_space<vmem>>, vector<16x128xf32>
      tpu.vector_store %arg7[%c0_11, %c0_12], %12 {strides = array<i32>} : memref<16x128xf32, #tpu.memory_space<vmem>>, vector<16x128xf32>,
    } else {
    }
    %c0 = arith.constant 0 : index
    %c0_1 = arith.constant 0 : index
    %3 = vector.load %arg7[%c0, %c0_1] : memref<16x128xf32, #tpu.memory_space<vmem>>, vector<16x128xf32>
    %c0_2 = arith.constant 0 : index
    %c0_3 = arith.constant 0 : index
    %4 = vector.load %arg3[%c0_2, %c0_3] : memref<16x128xf32, #tpu.memory_space<vmem>>, vector<16x128xf32>
    %c0_4 = arith.constant 0 : index
    %c0_5 = arith.constant 0 : index
    %5 = vector.load %arg4[%c0_4, %c0_5] : memref<128x128xf32, #tpu.memory_space<vmem>>, vector<128x128xf32>
    %cst = arith.constant dense<0.000000e+00> : vector<16x128xf32>
    %6 = tpu.matmul %4, %5, %cst {dimension_numbers = #tpu.dot_dimension_numbers<[1], [0], [0], [1], [0, 0, 1, 1], [], []>} : vector<16x128xf32>, vector<128x128xf32>, vector<16x128xf32> -> vector<16x128xf32>
    %7 = arith.addf %3, %6 : vector<16x128xf32>
    %c0_6 = arith.constant 0 : index
    %c0_7 = arith.constant 0 : index
    %8 = vector.load %arg7[%c0_6, %c0_7] : memref<16x128xf32, #tpu.memory_space<vmem>>, vector<16x128xf32>
    tpu.vector_store %arg7[%c0_6, %c0_7], %7 {strides = array<i32>} : memref<16x128xf32, #tpu.memory_space<vmem>>, vector<16x128xf32>,
    %c0_i32_8 = arith.constant 0 : i32
    %9 = arith.cmpi eq, %arg2, %c0_i32_8 : i32
    %10 = arith.extui %9 : i1 to i32
    %c0_i32_9 = arith.constant 0 : i32
    %11 = arith.cmpi ne, %10, %c0_i32_9 : i32
    scf.if %11 {
      %c0_10 = arith.constant 0 : index
      %c0_11 = arith.constant 0 : index
      %12 = vector.load %arg7[%c0_10, %c0_11] : memref<16x128xf32, #tpu.memory_space<vmem>>, vector<16x128xf32>
      %c0_12 = arith.constant 0 : index
      %c0_13 = arith.constant 0 : index
      %13 = vector.load %arg5[%c0_12, %c0_13] : memref<1x128xf32, #tpu.memory_space<vmem>>, vector<1x128xf32>
      %14 = vector.broadcast %13 : vector<1x128xf32> to vector<16x128xf32>
      %15 = arith.addf %12, %14 : vector<16x128xf32>
      %c0_14 = arith.constant 0 : index
      %c0_15 = arith.constant 0 : index
      %16 = vector.load %arg6[%c0_14, %c0_15] : memref<16x128xf32, #tpu.memory_space<vmem>>, vector<16x128xf32>
      tpu.vector_store %arg6[%c0_14, %c0_15], %15 {strides = array<i32>} : memref<16x128xf32, #tpu.memory_space<vmem>>, vector<16x128xf32>,
    } else {
    }
    return
  }
  func.func @transform_0(%arg0: i32, %arg1: i32, %arg2: i32) -> (i32, i32) {
    %c0_i32 = arith.constant 0 : i32
    return %arg0, %arg2 : i32, i32
  }
  func.func @transform_1(%arg0: i32, %arg1: i32, %arg2: i32) -> (i32, i32) {
    %c0_i32 = arith.constant 0 : i32
    return %arg2, %arg1 : i32, i32
  }
  func.func @transform_2(%arg0: i32, %arg1: i32, %arg2: i32) -> (i32, i32) {
    %c0_i32 = arith.constant 0 : i32
    %c0_i32_0 = arith.constant 0 : i32
    return %c0_i32, %arg1 : i32, i32
  }
  func.func @transform_3(%arg0: i32, %arg1: i32, %arg2: i32) -> (i32, i32) {
    %c0_i32 = arith.constant 0 : i32
    return %arg0, %arg1 : i32, i32
  }
}

</mosaic_0001>

<bundles_post_ra>
// kernel: tpu_custom_call.1
= control target key start
LH: loop header
LB: loop body
LE: loop exit
PB: predicated region body
PF: predicated region fallthrough
CT: control target
= control target key end

     0   :  { %8 = vsyncpa [#allocation4], 0  ;;  %s279_s0 = inlined_call_operand.hbm [shape: f32[16,128], index: 0, kind: input, shape index: {}]   ;;  %s280_s1 = inlined_call_operand.hbm [shape: f32[128,128], index: 1, kind: input, shape index: {}]   ;;  %s281_s2 = inlined_call_operand.vmem [shape: f32[1,128], index: 2, kind: input, shape index: {}]   ;;  %s282_s3 = inlined_call_operand.hbm [shape: f32[16,128], index: 3, kind: output, shape index: {}]  }
   0x1   :  { %9 = vsyncpa [#allocation7], 0 }
   0x2   :  { %10 = vsyncpa [#allocation5], 0  ;;  %s15_s14 = sshll.u32 %s279_s0, 4  ;;  %s233_s15 = smov [#allocation3]   ;;  %s16_s14 = int_to_ptr.hbm [resolvable:$true] %s15_s14 }
   0x3   :  { %s17_s16 = sshll.u32 %s233_s15, 4  ;;  %s28_s19 = sshll.u32 %s280_s1, 4  ;;  %s18_s16 = int_to_ptr.vmem [resolvable:$true] %s17_s16  ;;  %s29_s19 = int_to_ptr.hbm [resolvable:$true] %s28_s19 }
   0x4   :  { %s234_s20 = smov 128   ;;  %s235_s21 = smov 8  }
   0x5   :  { %23 = dma.hbm_to_vmem [thread:$0]  %s16_s14, 256, %s18_s16, [#allocation4], %s234_s20, %s234_s20, %s235_s21  }
   0x6   :  { %s236_s22 = smov [#allocation6]  }
   0x7   :  { %s30_s23 = sshll.u32 %s236_s22, 4  ;;  %s31_s23 = int_to_ptr.vmem [resolvable:$true] %s30_s23 }
   0x8   :  { %36 = dma.hbm_to_vmem [thread:$0]  %s29_s19, 2048, %s31_s23, [#allocation7], %s234_s20, %s234_s20, %s235_s21  }
   0x9   :  { %227 = dma.done.wait [#allocation4], 256  }
   0xa   :  { %228 = vsyncadd [#allocation4], 4294967040 }
   0xb   :  { %229 = dma.done.wait [#allocation7], 2048  }
   0xc   :  { %230 = vsyncadd [#allocation7], 4294965248  ;;  %v72_v0 = vld [vmem:[#allocation6 + $0x78] sm:$0xff]  ;;  %v71_v1 = vld [vmem:[#allocation6 + $0x70] sm:$0xff]  ;;  %s237_s24 = smov [#allocation8]   ;;  %s119_s28 = sshll.u32 %s282_s3, 4  ;;  %s120_s28 = int_to_ptr.hbm [resolvable:$true] %s119_s28 }
   0xd   :  { %73 = vmatpush.msra.mxu0 %v72_v0  ;;  %133 = vmatpush.msra.mxu1 %v72_v0  ;;  %v70_v2 = vld [vmem:[#allocation6 + $0x68] sm:$0xff]  ;;  %v69_v3 = vld [vmem:[#allocation6 + $0x60] sm:$0xff]  ;;  %v68_v4 = vld [vmem:[#allocation6 + $0x58] sm:$0xff]  ;;  %s117_s25 = sshll.u32 %s237_s24, 4  ;;  %s118_s25 = int_to_ptr.vmem [resolvable:$true] %s117_s25 }
   0xe   :  { %v67_v5 = vld [vmem:[#allocation6 + $0x50] sm:$0xff]  ;;  %v66_v6 = vld [vmem:[#allocation6 + $0x48] sm:$0xff]  ;;  %v65_v7 = vld [vmem:[#allocation6 + $0x40] sm:$0xff] }
   0xf   :  { %74 = vmatpush.msra.mxu0 %v71_v1  ;;  %134 = vmatpush.msra.mxu1 %v71_v1  ;;  %v64_v8 = vld [vmem:[#allocation6 + $0x38] sm:$0xff]  ;;  %v63_v9 = vld [vmem:[#allocation6 + $0x30] sm:$0xff]  ;;  %v62_v10 = vld [vmem:[#allocation6 + $0x28] sm:$0xff] }
  0x10   :  { %v61_v11 = vld [vmem:[#allocation6 + $0x20] sm:$0xff]  ;;  %v60_v12 = vld [vmem:[#allocation6 + $0x18] sm:$0xff]  ;;  %v59_v13 = vld [vmem:[#allocation6 + $0x10] sm:$0xff] }
  0x11   :  { %75 = vmatpush.msra.mxu0 %v70_v2  ;;  %135 = vmatpush.msra.mxu1 %v70_v2  ;;  %v58_v14 = vld [vmem:[#allocation6 + $0x8] sm:$0xff]  ;;  %v57_v15 = vld [vmem:[#allocation6] sm:$0xff]  ;;  %v55_v16 = vld [vmem:[#allocation3] sm:$0xff] }
  0x12   :  { %v56_v17 = vld [vmem:[#allocation3 + $0x8] sm:$0xff]  ;;  %v154_v18 = vld [vmem:[%s281_s2] ss:$0 sm:$0xff] }
  0x13   :  { %76 = vmatpush.msra.mxu0 %v69_v3  ;;  %136 = vmatpush.msra.mxu1 %v69_v3 }
  0x15   :  { %77 = vmatpush.msra.mxu0 %v68_v4  ;;  %137 = vmatpush.msra.mxu1 %v68_v4 }
  0x17   :  { %78 = vmatpush.msra.mxu0 %v67_v5  ;;  %138 = vmatpush.msra.mxu1 %v67_v5 }
  0x19   :  { %79 = vmatpush.msra.mxu0 %v66_v6  ;;  %139 = vmatpush.msra.mxu1 %v66_v6 }
  0x1b   :  { %80 = vmatpush.msra.mxu0 %v65_v7  ;;  %140 = vmatpush.msra.mxu1 %v65_v7 }
  0x1d   :  { %81 = vmatpush.msra.mxu0 %v64_v8  ;;  %141 = vmatpush.msra.mxu1 %v64_v8 }
  0x1f   :  { %82 = vmatpush.msra.mxu0 %v63_v9  ;;  %142 = vmatpush.msra.mxu1 %v63_v9 }
  0x21   :  { %83 = vmatpush.msra.mxu0 %v62_v10  ;;  %143 = vmatpush.msra.mxu1 %v62_v10 }
  0x23   :  { %84 = vmatpush.msra.mxu0 %v61_v11  ;;  %144 = vmatpush.msra.mxu1 %v61_v11 }
  0x25   :  { %85 = vmatpush.msra.mxu0 %v60_v12  ;;  %145 = vmatpush.msra.mxu1 %v60_v12 }
  0x27   :  { %86 = vmatpush.msra.mxu0 %v59_v13  ;;  %146 = vmatpush.msra.mxu1 %v59_v13 }
  0x29   :  { %87 = vmatpush.msra.mxu0 %v58_v14  ;;  %147 = vmatpush.msra.mxu1 %v58_v14 }
  0x2b   :  { %88 = vmatpush.msra.mxu0 %v57_v15  ;;  %148 = vmatpush.msra.mxu1 %v57_v15 }
  0x2c   :  { %89 = vmatmul.f32.vlgmr.msra.gmra.mxu0 %v55_v16  ;;  %92 = vmatmul.f32.vlgmr.msra.gmra.mxu1 %v56_v17 }
  0xa9   :  { %v90_v19 = vpop.f32.mrf.mxu0  ;;  %v93_v20 = vpop.f32.mrf.mxu1 }
  0xaa   :  { %v109_v21 = vadd.f32 %v154_v18, %v90_v19  ;;  %v110_v22 = vadd.f32 %v154_v18, %v93_v20 }
  0xac   :  { %111 = vst [vmem:[#allocation8] sm:$0xff] %v109_v21 }
  0xad   :  { %112 = vst [vmem:[#allocation8 + $0x8] sm:$0xff] %v110_v22 }
  0xae   :  { %125 = dma.vmem_to_hbm [thread:$0]  %s118_s25, 256, %s120_s28, [#allocation5], %s234_s20, %s234_s20, %s235_s21  }
  0xaf   :  { %231 = dma.done.wait [#allocation5], 256  }
  0xb0   :  { %232 = vsyncadd [#allocation5], 4294967040 }
  0xb1   :  { %130 = vsyncpa [#allocation4], 1 }
  0xb2   :  { %131 = vsyncpa [#allocation7], 1 }
  0xb3   :  { %132 = vsyncpa [#allocation5], 1 }

</bundles_post_ra>
